<compile_context>
chip_gen: v6e
topology: v6e:2x2x1
jax: 0.10.0
libtpu: 0.0.40
codegen_flags: <defaults>
</compile_context>

<pallas_src>
import functools

import jax
import jax.numpy as jnp
from jax import lax
from jax.experimental import pallas as pl
from jax.experimental.pallas import tpu as pltpu


def _round_up(x, m):
    return ((x + m - 1) // m) * m


def _protonet_kernel(x_ref, w_ref, b_ref, avg_ref, yoh_ref,
                     logits_ref, stats_ref, *, ns_pad, num_ways, nq):
    """One grid step == one few-shot episode."""
    nq_pad = yoh_ref.shape[0]
    wpad = yoh_ref.shape[1]

    # ---- encoder (stand-in for self.model): single fused bf16 MXU matmul ----
    # TODO(synk): the real backbone `self.model` is external to this module; a
    # linear encoder (bf16 weights, f32 accumulation) is the deterministic stand-in.
    x = x_ref[0]                                   # (Ntot, K) bf16  [support | query]
    emb = jnp.dot(x, w_ref[...], preferred_element_type=jnp.float32) + b_ref[...]
    emb_s = emb[:ns_pad, :]                        # (Ns_pad, D) f32
    emb_q = emb[ns_pad:ns_pad + nq_pad, :]         # (Nq_pad, D) f32

    # ---- prototypes: proto.reshape(ways, shots, -1).mean(dim=1) ----
    # Padded averaging matmul (wpad, Ns_pad) @ (Ns_pad, D): row c holds
    # 1/shots over class-c support rows, so proto_pad[c] is exactly the class-c
    # support mean for c < num_ways and 0 otherwise.
    proto_pad = jnp.dot(avg_ref[...], emb_s, preferred_element_type=jnp.float32)  # (wpad, D)
    pt = proto_pad.T                                                               # (D, wpad)

    # ---- logits = -||q - p||^2 = 2*q.p - ||q||^2 - ||p||^2 (all f32) ----
    cross = jnp.dot(emb_q, pt, preferred_element_type=jnp.float32)   # (Nq_pad, wpad) MXU
    pn = jnp.sum(pt * pt, axis=0, keepdims=True)                     # (1, wpad)
    qn = jnp.sum(emb_q * emb_q, axis=1, keepdims=True)               # (Nq_pad, 1)
    logits = 2.0 * cross - qn - pn                                   # (Nq_pad, wpad)

    # mask padded class columns with a large negative (finite, so 0*mask stays 0)
    col = lax.broadcasted_iota(jnp.int32, (nq_pad, wpad), 1)
    logits = jnp.where(col < num_ways, logits, jnp.float32(-1e30))
    logits_ref[0] = logits                                           # lane-dense store

    # ---- cross-entropy loss (mean over real queries) + accuracy ----
    yoh = yoh_ref[...]                                               # (Nq_pad, wpad) one-hot
    row_valid = jnp.sum(yoh, axis=-1, keepdims=True)                 # 1.0 real row, 0.0 pad row
    m = jnp.max(logits, axis=-1, keepdims=True)
    lse = m + jnp.log(jnp.sum(jnp.exp(logits - m), axis=-1, keepdims=True))
    true_logit = jnp.sum(logits * yoh, axis=-1, keepdims=True)

    # argmax with lowest-index tie-break, done as a masked min over lane indices
    big = jnp.int32(wpad)
    pred = jnp.min(jnp.where(logits == m, col, big), axis=-1, keepdims=True)
    ytru = jnp.min(jnp.where(yoh > 0.5, col, big), axis=-1, keepdims=True)
    correct = (pred == ytru).astype(jnp.float32) * row_valid

    inv_nq = jnp.float32(1.0 / nq)
    loss = jnp.sum(row_valid * (lse - true_logit)) * inv_nq
    acc = jnp.sum(correct) * inv_nq

    # merged (loss, acc) stats in one lane-dense (8, 128) tile:
    # stats[0, 0] = loss, stats[0, 1] = acc, rest 0.
    r = lax.broadcasted_iota(jnp.int32, (8, 128), 0)
    c = lax.broadcasted_iota(jnp.int32, (8, 128), 1)
    stats_ref[0] = jnp.where((r == 0) & (c == 0), loss,
                             jnp.where((r == 0) & (c == 1), acc, 0.0))


def protonet_forward(x_support, x_query, y_query, w, b, *, num_ways, num_shots):
    """Batched-episode ProtoNet forward.

    x_support: (E, ways*shots, C, H, W)   x_query: (E, ways*shots_test, C, H, W)
    y_query:   (ways*shots_test,) int     w: (K, D)   b: (D,)
    Returns per-episode (loss (E,), acc (E,), logits (E, Nq, ways)).
    """
    E, Ns = x_support.shape[0], x_support.shape[1]
    Nq = x_query.shape[1]
    xs = x_support.reshape(E, Ns, -1).astype(jnp.float32)
    xq = x_query.reshape(E, Nq, -1).astype(jnp.float32)
    K = xs.shape[-1]
    D = w.shape[1]
    assert w.shape[0] == K

    ns_pad = _round_up(Ns, 8)
    nq_pad = _round_up(Nq, 8)
    nt = ns_pad + nq_pad
    wpad = _round_up(num_ways, 128)

    # fused encoder operand: [support rows | pad | query rows | pad], bf16 for the MXU
    xs_p = jnp.pad(xs, ((0, 0), (0, ns_pad - Ns), (0, 0)))
    xq_p = jnp.pad(xq, ((0, 0), (0, nq_pad - Nq), (0, 0)))
    x_all = jnp.concatenate([xs_p, xq_p], axis=1).astype(jnp.bfloat16)   # (E, nt, K)

    w_b = w.astype(jnp.bfloat16)
    b2 = b.reshape(1, D).astype(jnp.float32)

    # padded averaging matrix (wpad, ns_pad): row c has 1/shots over class-c support rows
    avg = jnp.repeat(jnp.eye(num_ways, dtype=jnp.float32), num_shots, axis=1) / num_shots
    avg_pad = jnp.pad(avg, ((0, wpad - num_ways), (0, ns_pad - Ns)))

    # padded one-hot labels (shared across episodes, as in the module)
    yoh = jax.nn.one_hot(y_query, wpad, dtype=jnp.float32)               # (Nq, wpad)
    yoh_p = jnp.pad(yoh, ((0, nq_pad - Nq), (0, 0)))                     # (nq_pad, wpad)

    kernel = functools.partial(_protonet_kernel, ns_pad=ns_pad,
                               num_ways=num_ways, nq=Nq)

    grid_spec = pltpu.PrefetchScalarGridSpec(
        num_scalar_prefetch=0,
        grid=(E,),
        in_specs=[
            pl.BlockSpec((1, nt, K), lambda e: (e, 0, 0)),       # x_all (per episode)
            pl.BlockSpec((K, D), lambda e: (0, 0)),              # w (shared)
            pl.BlockSpec((1, D), lambda e: (0, 0)),              # b (shared)
            pl.BlockSpec((wpad, ns_pad), lambda e: (0, 0)),      # avg_pad (shared)
            pl.BlockSpec((nq_pad, wpad), lambda e: (0, 0)),      # one-hot labels (shared)
        ],
        out_specs=[
            pl.BlockSpec((1, nq_pad, wpad), lambda e: (e, 0, 0)),  # logits (lane-dense)
            pl.BlockSpec((1, 8, 128), lambda e: (e, 0, 0)),        # stats: loss, acc
        ],
    )

    logits_full, stats = pl.pallas_call(
        kernel,
        out_shape=(
            jax.ShapeDtypeStruct((E, nq_pad, wpad), jnp.float32),
            jax.ShapeDtypeStruct((E, 8, 128), jnp.float32),
        ),
        grid_spec=grid_spec,
        compiler_params=pltpu.CompilerParams(dimension_semantics=("parallel",)),
    )(x_all, w_b, b2, avg_pad, yoh_p)

    loss = stats[:, 0, 0]
    acc = stats[:, 0, 1]
    logits = logits_full[:, :Nq, :num_ways]
    return loss, acc, logits


if __name__ == "__main__":
    # few-shot episode config (small, consistent with the module's forward)
    num_ways, num_shots, num_shots_test = 4, 2, 3
    C, H, W = 4, 16, 16
    D = 128                      # lane-dense embedding width (multiple of 128)
    K = C * H * W
    E = 2                        # episodes batched on the parallel grid axis

    key = jax.random.PRNGKey(0)
    k1, k2, k3, k4 = jax.random.split(key, 4)
    x_support = jax.random.normal(k1, (E, num_ways * num_shots, C, H, W), jnp.float32)
    x_query = jax.random.normal(k2, (E, num_ways * num_shots_test, C, H, W), jnp.float32)
    # y_query = repeat(range(num_ways), num_shots_test), as in the module
    y_query = jnp.repeat(jnp.arange(num_ways, dtype=jnp.int32), num_shots_test)
    w = jax.random.normal(k3, (K, D), jnp.float32) * 0.02
    b = jax.random.normal(k4, (D,), jnp.float32) * 0.01

    loss, acc, logits = protonet_forward(
        x_support, x_query, y_query, w, b, num_ways=num_ways, num_shots=num_shots)
    jax.block_until_ready((loss, acc, logits))

    # pure-JAX reference (same semantics as the PyTorch forward; the encoder
    # matmul uses the same bf16 inputs / f32 accumulation as the kernel, since
    # the bf16 cast is an intentional MXU optimization).
    wb = w.astype(jnp.bfloat16)
    for e in range(E):
        xs = x_support[e].reshape(num_ways * num_shots, -1).astype(jnp.bfloat16)
        xq = x_query[e].reshape(num_ways * num_shots_test, -1).astype(jnp.bfloat16)
        es = jnp.dot(xs, wb, preferred_element_type=jnp.float32) + b
        eq = jnp.dot(xq, wb, preferred_element_type=jnp.float32) + b
        proto_ref = es.reshape(num_ways, num_shots, -1).mean(axis=1)
        d = eq[:, None, :] - proto_ref[None, :, :]
        logits_ref = -jnp.sum(d * d, axis=-1)
        logp = jax.nn.log_softmax(logits_ref, axis=-1)
        loss_ref = -jnp.mean(logp[jnp.arange(logits_ref.shape[0]), y_query])
        acc_ref = jnp.mean((jnp.argmax(logits_ref, axis=-1) == y_query).astype(jnp.float32))

        assert jnp.allclose(logits[e], logits_ref, atol=1e-2, rtol=1e-3), e
        assert jnp.allclose(loss[e], loss_ref, atol=5e-3, rtol=1e-3), e
        assert jnp.allclose(acc[e], acc_ref, atol=1e-6), e

    print("KERNEL_OK")
</pallas_src>

<mosaic_0001>
module attributes {stable_mosaic.version = 11 : i64} {
  func.func @_protonet_kernel(%arg0: i32, %arg1: memref<1x24x1024xbf16, #tpu.memory_space<vmem>>, %arg2: memref<1024x128xbf16, #tpu.memory_space<vmem>>, %arg3: memref<1x128xf32, #tpu.memory_space<vmem>>, %arg4: memref<128x8xf32, #tpu.memory_space<vmem>>, %arg5: memref<16x128xf32, #tpu.memory_space<vmem>>, %arg6: memref<1x16x128xf32, #tpu.memory_space<vmem>>, %arg7: memref<1x8x128xf32, #tpu.memory_space<vmem>>) attributes {dimension_semantics = [#tpu.dimension_semantics<parallel>], iteration_bounds = array<i64: 2>, scalar_prefetch = 0 : i64, scratch_operands = 0 : i64, tpu.core_type = #tpu.core_type<tc>, window_params = [{transform_indices = @transform_0, window_bounds = array<i64: 1, 24, 1024>}, {pipeline_mode = #tpu.pipeline_mode<synchronous>, transform_indices = @transform_1, window_bounds = array<i64: 1024, 128>}, {pipeline_mode = #tpu.pipeline_mode<synchronous>, transform_indices = @transform_2, window_bounds = array<i64: 1, 128>}, {pipeline_mode = #tpu.pipeline_mode<synchronous>, transform_indices = @transform_3, window_bounds = array<i64: 128, 8>}, {pipeline_mode = #tpu.pipeline_mode<synchronous>, transform_indices = @transform_4, window_bounds = array<i64: 16, 128>}, {transform_indices = @transform_5, window_bounds = array<i64: 1, 16, 128>}, {transform_indices = @transform_6, window_bounds = array<i64: 1, 8, 128>}]} {
    %c0 = arith.constant 0 : index
    %c0_0 = arith.constant 0 : index
    %c0_1 = arith.constant 0 : index
    %0 = vector.load %arg1[%c0, %c0_0, %c0_1] : memref<1x24x1024xbf16, #tpu.memory_space<vmem>>, vector<1x24x1024xbf16>
    %1 = vector.shape_cast %0 : vector<1x24x1024xbf16> to vector<24x1024xbf16>
    %c0_2 = arith.constant 0 : index
    %c0_3 = arith.constant 0 : index
    %2 = vector.load %arg2[%c0_2, %c0_3] : memref<1024x128xbf16, #tpu.memory_space<vmem>>, vector<1024x128xbf16>
    %cst = arith.constant dense<0.000000e+00> : vector<24x128xf32>
    %3 = tpu.matmul %1, %2, %cst {dimension_numbers = #tpu.dot_dimension_numbers<[1], [0], [0], [1], [0, 0, 1, 1], [], []>} : vector<24x1024xbf16>, vector<1024x128xbf16>, vector<24x128xf32> -> vector<24x128xf32>
    %c0_4 = arith.constant 0 : index
    %c0_5 = arith.constant 0 : index
    %4 = vector.load %arg3[%c0_4, %c0_5] : memref<1x128xf32, #tpu.memory_space<vmem>>, vector<1x128xf32>
    %5 = vector.broadcast %4 : vector<1x128xf32> to vector<24x128xf32>
    %6 = arith.addf %3, %5 : vector<24x128xf32>
    %7 = vector.extract_strided_slice %6 {offsets = [0, 0], sizes = [8, 128], strides = [1, 1]} : vector<24x128xf32> to vector<8x128xf32>
    %8 = vector.extract_strided_slice %6 {offsets = [8, 0], sizes = [16, 128], strides = [1, 1]} : vector<24x128xf32> to vector<16x128xf32>
    %c0_6 = arith.constant 0 : index
    %c0_7 = arith.constant 0 : index
    %9 = vector.load %arg4[%c0_6, %c0_7] : memref<128x8xf32, #tpu.memory_space<vmem>>, vector<128x8xf32>
    %cst_8 = arith.constant dense<0.000000e+00> : vector<128x128xf32>
    %10 = tpu.matmul %9, %7, %cst_8 {dimension_numbers = #tpu.dot_dimension_numbers<[1], [0], [0], [1], [0, 0, 1, 1], [], []>} : vector<128x8xf32>, vector<8x128xf32>, vector<128x128xf32> -> vector<128x128xf32>
    %11 = tpu.transpose %10, [1, 0] : vector<128x128xf32> -> vector<128x128xf32>
    %cst_9 = arith.constant dense<0.000000e+00> : vector<16x128xf32>
    %12 = tpu.matmul %8, %11, %cst_9 {dimension_numbers = #tpu.dot_dimension_numbers<[1], [0], [0], [1], [0, 0, 1, 1], [], []>} : vector<16x128xf32>, vector<128x128xf32>, vector<16x128xf32> -> vector<16x128xf32>
    %13 = arith.mulf %11, %11 : vector<128x128xf32>
    %cst_10 = arith.constant dense<0.000000e+00> : vector<128xf32>
    %14 = vector.multi_reduction <add>, %13, %cst_10 [0] : vector<128x128xf32> to vector<128xf32>
    %15 = vector.shape_cast %14 : vector<128xf32> to vector<1x128xf32>
    %16 = arith.mulf %8, %8 : vector<16x128xf32>
    %cst_11 = arith.constant dense<0.000000e+00> : vector<16xf32>
    %17 = vector.multi_reduction <add>, %16, %cst_11 [1] : vector<16x128xf32> to vector<16xf32>
    %18 = vector.shape_cast %17 : vector<16xf32> to vector<16x1xf32>
    %cst_12 = arith.constant 2.000000e+00 : f32
    %19 = vector.broadcast %cst_12 : f32 to vector<16x128xf32>
    %20 = arith.mulf %19, %12 : vector<16x128xf32>
    %21 = vector.broadcast %18 : vector<16x1xf32> to vector<16x128xf32>
    %22 = arith.subf %20, %21 : vector<16x128xf32>
    %23 = vector.broadcast %15 : vector<1x128xf32> to vector<16x128xf32>
    %24 = arith.subf %22, %23 : vector<16x128xf32>
    %25 = tpu.iota {dimensions = array<i32: 1>} : vector<16x128xi32>
    %c4_i32 = arith.constant 4 : i32
    %26 = vector.broadcast %c4_i32 : i32 to vector<16x128xi32>
    %27 = arith.cmpi slt, %25, %26 : vector<16x128xi32>
    %cst_13 = arith.constant -1.000000e+30 : f32
    %28 = vector.broadcast %cst_13 : f32 to vector<16x128xf32>
    %29 = arith.select %27, %24, %28 : vector<16x128xi1>, vector<16x128xf32>
    %c0_14 = arith.constant 0 : index
    %c0_15 = arith.constant 0 : index
    %c0_16 = arith.constant 0 : index
    %30 = vector.load %arg6[%c0_14, %c0_15, %c0_16] : memref<1x16x128xf32, #tpu.memory_space<vmem>>, vector<1x16x128xf32>
    %31 = vector.shape_cast %30 : vector<1x16x128xf32> to vector<16x128xf32>
    %32 = vector.shape_cast %29 : vector<16x128xf32> to vector<1x16x128xf32>
    tpu.vector_store %arg6[%c0_14, %c0_15, %c0_16], %32 {strides = array<i32>} : memref<1x16x128xf32, #tpu.memory_space<vmem>>, vector<1x16x128xf32>,
    %c0_17 = arith.constant 0 : index
    %c0_18 = arith.constant 0 : index
    %33 = vector.load %arg5[%c0_17, %c0_18] : memref<16x128xf32, #tpu.memory_space<vmem>>, vector<16x128xf32>
    %cst_19 = arith.constant dense<0.000000e+00> : vector<16xf32>
    %34 = vector.multi_reduction <add>, %33, %cst_19 [1] : vector<16x128xf32> to vector<16xf32>
    %35 = vector.shape_cast %34 : vector<16xf32> to vector<16x1xf32>
    %cst_20 = arith.constant dense<0xFF800000> : vector<16xf32>
    %36 = vector.multi_reduction <maximumf>, %29, %cst_20 [1] : vector<16x128xf32> to vector<16xf32>
    %37 = vector.shape_cast %36 : vector<16xf32> to vector<16x1xf32>
    %38 = vector.broadcast %37 : vector<16x1xf32> to vector<16x128xf32>
    %39 = arith.subf %29, %38 : vector<16x128xf32>
    %40 = math.exp %39 : vector<16x128xf32>
    %cst_21 = arith.constant dense<0.000000e+00> : vector<16xf32>
    %41 = vector.multi_reduction <add>, %40, %cst_21 [1] : vector<16x128xf32> to vector<16xf32>
    %42 = vector.shape_cast %41 : vector<16xf32> to vector<16x1xf32>
    %43 = math.log %42 : vector<16x1xf32>
    %44 = arith.addf %37, %43 : vector<16x1xf32>
    %45 = arith.mulf %29, %33 : vector<16x128xf32>
    %cst_22 = arith.constant dense<0.000000e+00> : vector<16xf32>
    %46 = vector.multi_reduction <add>, %45, %cst_22 [1] : vector<16x128xf32> to vector<16xf32>
    %47 = vector.shape_cast %46 : vector<16xf32> to vector<16x1xf32>
    %48 = vector.broadcast %37 : vector<16x1xf32> to vector<16x128xf32>
    %49 = arith.cmpf oeq, %29, %48 : vector<16x128xf32>
    %c128_i32 = arith.constant 128 : i32
    %50 = vector.broadcast %c128_i32 : i32 to vector<16x128xi32>
    %51 = arith.select %49, %25, %50 : vector<16x128xi1>, vector<16x128xi32>
    %cst_23 = arith.constant dense<2147483647> : vector<16xi32>
    %52 = vector.multi_reduction <minsi>, %51, %cst_23 [1] : vector<16x128xi32> to vector<16xi32>
    %53 = vector.shape_cast %52 : vector<16xi32> to vector<16x1xi32>
    %cst_24 = arith.constant 5.000000e-01 : f32
    %54 = vector.broadcast %cst_24 : f32 to vector<16x128xf32>
    %55 = arith.cmpf ogt, %33, %54 : vector<16x128xf32>
    %c128_i32_25 = arith.constant 128 : i32
    %56 = vector.broadcast %c128_i32_25 : i32 to vector<16x128xi32>
    %57 = arith.select %55, %25, %56 : vector<16x128xi1>, vector<16x128xi32>
    %cst_26 = arith.constant dense<2147483647> : vector<16xi32>
    %58 = vector.multi_reduction <minsi>, %57, %cst_26 [1] : vector<16x128xi32> to vector<16xi32>
    %59 = vector.shape_cast %58 : vector<16xi32> to vector<16x1xi32>
    %60 = arith.cmpi eq, %53, %59 : vector<16x1xi32>
    %61 = arith.extui %60 : vector<16x1xi1> to vector<16x1xi32>
    %62 = arith.sitofp %61 : vector<16x1xi32> to vector<16x1xf32>
    %63 = arith.mulf %62, %35 : vector<16x1xf32>
    %64 = arith.subf %44, %47 : vector<16x1xf32>
    %65 = arith.mulf %35, %64 : vector<16x1xf32>
    %66 = vector.shape_cast %65 : vector<16x1xf32> to vector<1x16x1xf32>
    %cst_27 = arith.constant dense<0.000000e+00> : vector<1xf32>
    %67 = vector.multi_reduction <add>, %66, %cst_27 [1, 2] : vector<1x16x1xf32> to vector<1xf32>
    %68 = vector.shape_cast %67 : vector<1xf32> to vector<1x1x1xf32>
    %69 = vector.extract %68[0, 0, 0] : f32 from vector<1x1x1xf32>
    %cst_28 = arith.constant 0.0833333358 : f32
    %70 = arith.mulf %69, %cst_28 : f32
    %71 = vector.shape_cast %63 : vector<16x1xf32> to vector<1x16x1xf32>
    %cst_29 = arith.constant dense<0.000000e+00> : vector<1xf32>
    %72 = vector.multi_reduction <add>, %71, %cst_29 [1, 2] : vector<1x16x1xf32> to vector<1xf32>
    %73 = vector.shape_cast %72 : vector<1xf32> to vector<1x1x1xf32>
    %74 = vector.extract %73[0, 0, 0] : f32 from vector<1x1x1xf32>
    %cst_30 = arith.constant 0.0833333358 : f32
    %75 = arith.mulf %74, %cst_30 : f32
    %76 = tpu.iota {dimensions = array<i32: 0>} : vector<8x128xi32>
    %77 = tpu.iota {dimensions = array<i32: 1>} : vector<8x128xi32>
    %c0_i32 = arith.constant 0 : i32
    %78 = vector.broadcast %c0_i32 : i32 to vector<8x128xi32>
    %79 = arith.cmpi eq, %76, %78 : vector<8x128xi32>
    %c0_i32_31 = arith.constant 0 : i32
    %80 = vector.broadcast %c0_i32_31 : i32 to vector<8x128xi32>
    %81 = arith.cmpi eq, %77, %80 : vector<8x128xi32>
    %82 = arith.andi %79, %81 : vector<8x128xi1>
    %c0_i32_32 = arith.constant 0 : i32
    %83 = vector.broadcast %c0_i32_32 : i32 to vector<8x128xi32>
    %84 = arith.cmpi eq, %76, %83 : vector<8x128xi32>
    %c1_i32 = arith.constant 1 : i32
    %85 = vector.broadcast %c1_i32 : i32 to vector<8x128xi32>
    %86 = arith.cmpi eq, %77, %85 : vector<8x128xi32>
    %87 = arith.andi %84, %86 : vector<8x128xi1>
    %cst_33 = arith.constant 0.000000e+00 : f32
    %88 = vector.broadcast %75 : f32 to vector<8x128xf32>
    %89 = vector.broadcast %cst_33 : f32 to vector<8x128xf32>
    %90 = arith.select %87, %88, %89 : vector<8x128xi1>, vector<8x128xf32>
    %91 = vector.broadcast %70 : f32 to vector<8x128xf32>
    %92 = arith.select %82, %91, %90 : vector<8x128xi1>, vector<8x128xf32>
    %c0_34 = arith.constant 0 : index
    %c0_35 = arith.constant 0 : index
    %c0_36 = arith.constant 0 : index
    %93 = vector.load %arg7[%c0_34, %c0_35, %c0_36] : memref<1x8x128xf32, #tpu.memory_space<vmem>>, vector<1x8x128xf32>
    %94 = vector.shape_cast %93 : vector<1x8x128xf32> to vector<8x128xf32>
    %95 = vector.shape_cast %92 : vector<8x128xf32> to vector<1x8x128xf32>
    tpu.vector_store %arg7[%c0_34, %c0_35, %c0_36], %95 {strides = array<i32>} : memref<1x8x128xf32, #tpu.memory_space<vmem>>, vector<1x8x128xf32>,
    return
  }
  func.func @transform_0(%arg0: i32) -> (i32, i32, i32) {
    %c0_i32 = arith.constant 0 : i32
    %c0_i32_0 = arith.constant 0 : i32
    %c0_i32_1 = arith.constant 0 : i32
    return %arg0, %c0_i32, %c0_i32_0 : i32, i32, i32
  }
  func.func @transform_1(%arg0: i32) -> (i32, i32) {
    %c0_i32 = arith.constant 0 : i32
    %c0_i32_0 = arith.constant 0 : i32
    %c0_i32_1 = arith.constant 0 : i32
    return %c0_i32, %c0_i32_0 : i32, i32
  }
  func.func @transform_2(%arg0: i32) -> (i32, i32) {
    %c0_i32 = arith.constant 0 : i32
    %c0_i32_0 = arith.constant 0 : i32
    %c0_i32_1 = arith.constant 0 : i32
    return %c0_i32, %c0_i32_0 : i32, i32
  }
  func.func @transform_3(%arg0: i32) -> (i32, i32) {
    %c0_i32 = arith.constant 0 : i32
    %c0_i32_0 = arith.constant 0 : i32
    %c0_i32_1 = arith.constant 0 : i32
    return %c0_i32, %c0_i32_0 : i32, i32
  }
  func.func @transform_4(%arg0: i32) -> (i32, i32) {
    %c0_i32 = arith.constant 0 : i32
    %c0_i32_0 = arith.constant 0 : i32
    %c0_i32_1 = arith.constant 0 : i32
    return %c0_i32, %c0_i32_0 : i32, i32
  }
  func.func @transform_5(%arg0: i32) -> (i32, i32, i32) {
    %c0_i32 = arith.constant 0 : i32
    %c0_i32_0 = arith.constant 0 : i32
    %c0_i32_1 = arith.constant 0 : i32
    return %arg0, %c0_i32, %c0_i32_0 : i32, i32, i32
  }
  func.func @transform_6(%arg0: i32) -> (i32, i32, i32) {
    %c0_i32 = arith.constant 0 : i32
    %c0_i32_0 = arith.constant 0 : i32
    %c0_i32_1 = arith.constant 0 : i32
    return %arg0, %c0_i32, %c0_i32_0 : i32, i32, i32
  }
}

</mosaic_0001>

<bundles_post_ra>
// kernel: tpu_custom_call.1
= control target key start
LH: loop header
LB: loop body
LE: loop exit
PB: predicated region body
PF: predicated region fallthrough
CT: control target
= control target key end

     0   :  { %12 = vsyncpa [#allocation3], 0  ;;  %s2791_s0 = inlined_call_operand.hbm [shape: bf16[2,24,1024], index: 0, kind: input, shape index: {}]   ;;  %s2792_s1 = inlined_call_operand.hbm [shape: bf16[1024,128], index: 1, kind: input, shape index: {}]   ;;  %s2793_s2 = inlined_call_operand.vmem [shape: f32[1,128], index: 2, kind: input, shape index: {}]   ;;  %s2794_s3 = inlined_call_operand.vmem [shape: f32[128,8], index: 3, kind: input, shape index: {}]   ;;  %s2795_s4 = inlined_call_operand.vmem [shape: f32[16,128], index: 4, kind: input, shape index: {}]   ;;  %s2796_s5 = inlined_call_operand.hbm [shape: f32[2,16,128], index: 5, kind: output, shape index: {0}]   ;;  %s2797_s6 = inlined_call_operand.hbm [shape: f32[2,8,128], index: 6, kind: output, shape index: {1}]  }
   0x1   :  { %14 = vsyncpa [#allocation3 + $0x1], 0 }
   0x2   :  { %15 = vsyncpa [#allocation6], 0 }
   0x3   :  { %16 = vsyncpa [#allocation4], 0 }
   0x4   :  { %18 = vsyncpa [#allocation4 + $0x1], 0 }
   0x5   :  { %19 = vsyncpa [#allocation9], 0 }
   0x6   :  { %21 = vsyncpa [#allocation9 + $0x1], 0  ;;  %s2435_s21 = smov 0   ;;  %s2437_s22 = smov 0  }
   0x7   :  { %s2439_s23 = smov 0   ;;  %s2441_s24 = smov 0  }
   0x8 LB: > { %s2456_s25 = sadd.s32 4294967295, %s2387_s24   ;;  %s1755_s26 = sadd.s32 4294967294, %s2387_s24   ;;  %s2387_s24 = sphi %s2441_s24, %s2819_s24   ;;  %s2383_s23 = sphi %s2439_s23, %s2818_s23   ;;  %s2379_s22 = sphi %s2437_s22, %s2817_s22   ;;  %s2375_s21 = sphi %s2435_s21, %s2816_s21  }
   0x9   : > { %p47_p0 = scmp.ne.s32.totalorder %s2379_s22, %s2375_s21  ;;  %p2798_p1 = scmp.eq.s32.totalorder %s2456_s25, 0 }
   0xa   : > { %p161_p3 = scmp.eq.s32.totalorder %s1755_s26, 1  ;;  %p1756_p5 = scmp.ge.s32.totalorder %s2387_s24, 1 }
   0xb   : > { %p2465_p4 = por %p2798_p1, %p47_p0  ;;  %p194_p7 = scmp.lt.s32.totalorder %s2387_s24, 3 }
   0xc   : > { %p2470_p6 = por %p161_p3, %p47_p0  ;;  %s2389_s30 = smov [#allocation5]  }
   0xd   : > { %s2802_s27 = scalar_select %p2465_p4, 1, 0 }
   0xe   : > { %s2803_s28 = scalar_select %p2470_p6, 1, 0 }
   0xf   : > { %p2475_p8 = pnand %p1756_p5, %p194_p7  ;;  %s206_s7 = sshll.u32 %s2389_s30, 4  ;;  %s207_s7 = int_to_ptr.vmem [resolvable:$true] %s206_s7 }
  0x10   : > { %s2489_s9 = sadd.s32 1, %s2387_s24   ;;  %s34_s10 = sadd.s32 1, %s2383_s23 }
  0x11   : > { %s2804_s29 = scalar_select %p2475_p8, 1, 0 }
  0x12   : > { %p2096_p9 = pneg %p2475_p8  ;;  %s31_s11 = ssub.s32 %s2387_s24, %s2489_s9 }
  0x13   : > { %s2246_s12 = scalar_lea.vmem %s207_s7, 8192  ;;  %p2254_p5 = scmp.lt.s32.totalorder %s207_s7, %s207_s7 }
  0x14   : > { %p2484_p11 = pnand %p2096_p9, %p2798_p1  ;;  %p2247_p13 = scmp.ne.s32.totalorder %s207_s7, %s2246_s12 }
  0x15   : > { %p2255_p7 = scmp.lt.s32.totalorder %s2246_s12, %s2246_s12 }
  0x16   : > { %p2237_p12 = pneg %p2484_p11 }
  0x17   : > { %p2256_p10 = por %p2255_p7, %p2254_p5 }
  0x18   : > { %p2249_p0 = pnand %p2247_p13, %p2237_p12 }
  0x1a   : > { %p2250_p3 = pneg %p2249_p0 }
  0x1c   : > { %p2257_p2 = pnand %p2256_p10, %p2250_p3 }
  0x1e   : > { %2260 = shalt.err (!%p2257_p2)
}
  0x1f   : > { %s2390_s13 = smov 64   ;;  %s2391_s14 = smov 4  }
  0x20   : > { %2099 = dma.hbm_to_vmem [thread:$0]  (!%p2484_p11), %s2792_s1, 8192, %s207_s7, [#allocation6], %s2390_s13, %s2390_s13, %s2391_s14  }
  0x21   : > { %p32_p9 = scmp.eq.s32.totalorder %s31_s11, 0  ;;  %p41_p12 = scmp.ne.s32.totalorder %s2383_s23, %s2379_s22 }
  0x22   : > { %p42_p10 = scmp.eq.s32.totalorder %s2387_s24, 0  ;;  %p2112_p2 = scmp.lt.s32.totalorder %s2387_s24, 2 }
  0x23   : > { %s2506_s17 = scalar_select %p32_p9, %s2383_s23, %s34_s10  }
  0x24   : > { %p43_p13 = por %p42_p10, %p41_p12  ;;  %p2806_p0 = scmp.eq.s32.totalorder %s2456_s25, 1 }
  0x25   : > { %s229_s19 = sand.u32 1, %s2383_s23   ;;  %s2080_s20 = smul.u32 1536, %s2387_s24 }
  0x26   : > { %p2510_p3 = por %p2806_p0, %p41_p12  ;;  %s2079_s26 = smul.u32 96, %s229_s19 }
  0x27   : > { %s2519_s12 = scalar_lea.hbm %s2791_s0, %s2080_s20  ;;  %p2521_p11 = pnand %p2112_p2, %p43_p13 }
  0x28   : > { %s2807_s18 = scalar_select %p2510_p3, 1, 0 }
  0x29   : > { %s233_s10 = scalar_lea.vmem [#allocation2], %s2079_s26  ;;  %s2527_s13 = scalar_lea.sflag [#allocation3], %s229_s19 }
  0x2a   : > { %s240_s11 = sshll.u32 %s233_s10, 4  ;;  %s2261_s14 = scalar_lea.hbm %s2519_s12, 1536  ;;  %s2525_s11 = int_to_ptr.vmem [resolvable:$true] %s240_s11 }
  0x2b   : > { %p2262_p5 = scmp.ne.s32.totalorder %s2519_s12, %s2261_s14  ;;  %p2263_p7 = pneg %p2521_p11 }
  0x2c   : > { %s2266_s20 = scalar_lea.hbm %s2791_s0, 3072  ;;  %p2267_p10 = scmp.lt.s32.totalorder %s2519_s12, %s2791_s0 }
  0x2d   : > { %p2264_p9 = pnand %p2263_p7, %p2262_p5  ;;  %p2268_p2 = scmp.lt.s32.totalorder %s2266_s20, %s2261_s14 }
  0x2f   : > { %p2265_p12 = pneg %p2264_p9  ;;  %p2269_p13 = por %p2268_p2, %p2267_p10 }
  0x31   : > { %p2270_p0 = pnand %p2269_p13, %p2265_p12 }
  0x33   : > { %2273 = shalt.err (!%p2270_p0)
}
  0x34   : > { %s2274_s19 = scalar_lea.vmem %s2525_s11, 1536  ;;  %s2392_s26 = smov [#allocation2]  }
  0x35   : > { %p2275_p1 = scmp.ne.s32.totalorder %s2525_s11, %s2274_s19  ;;  %s2279_s10 = sshll.u32 %s2392_s26, 4  ;;  %s2280_s10 = int_to_ptr.vmem [resolvable:$false] %s2279_s10 }
  0x36   : > { %s2281_s15 = scalar_lea.vmem %s2280_s10, 3072  ;;  %p2282_p9 = scmp.lt.s32.totalorder %s2525_s11, %s2280_s10 }
  0x37   : > { %p2277_p6 = pnand %p2275_p1, %p2263_p7  ;;  %p2283_p3 = scmp.lt.s32.totalorder %s2281_s15, %s2274_s19 }
  0x39   : > { %p2278_p5 = pneg %p2277_p6  ;;  %p2284_p4 = por %p2283_p3, %p2282_p9 }
  0x3b   : > { %p2285_p8 = pnand %p2284_p4, %p2278_p5 }
  0x3d   : > { %2288 = shalt.err (!%p2285_p8)
}
  0x3e   : > { %s2393_s14 = smov 512   ;;  %s2394_s16 = smov 32  }
  0x3f   : > { %2103 = dma.hbm_to_vmem [thread:$0]  (!%p2521_p11), %s2519_s12, 1536, %s2525_s11, %s2527_s13, %s2393_s14, %s2393_s14, %s2394_s16  }
  0x40   : > { %p2809_p1 = scmp.ne.s32.totalorder %s2804_s29, 0 }
  0x41   : > { %s2551_s20 = sand.u32 (!%p2809_p1), 1, %s2379_s22   ;;  %p2810_p4 = scmp.ne.s32.totalorder (!%p2809_p1), %s2802_s27, 0 }
  0x42   : > { %252 = sbr.rel (%p2809_p1) target bundleno = 1647 (0x66f), region = 40  ;;  %s255_s8 = scalar_lea.sflag (!%p2809_p1), [#allocation3], %s2551_s20 }
  0x43   : > { %s2081_s30 = smul.u32 (!%p2809_p1), 96, %s2551_s20 }
  0x45   : > { %s2555_s19 = scalar_lea.vmem (!%p2809_p1), [#allocation2], %s2081_s30 }
  0x47   : > { %2358 = dma.done.wait (%p2810_p4), %s255_s8, 1536  }
  0x48   : > { %2360 = vsyncadd (%p2810_p4), %s255_s8, 4294965760  ;;  %p2811_p6 = scmp.eq.s32.totalorder %s2456_s25, 0 }
  0x4a   : > { %2362 = dma.done.wait (%p2811_p6), [#allocation6], 8192   ;;  %p2812_p8 = pmov %p2811_p6 }
  0x4b   : > { %v2155_v0 = vld [vmem:[#allocation5 + $0x78] sm:$0xff]   ;;  %v2159_v4 = vld [vmem:[#allocation5 + $0x70] sm:$0xff]   ;;  %v2163_v8 = vld [vmem:[#allocation5 + $0x68] sm:$0xff]   ;;  %vm1104_vm0 = vcmask 64512   ;;  %s1762_s15 = sshll.u32 %s2551_s20, 4  ;;  %vm1569_vm12 = vcmask 7168  }
  0x4c   : > { %2364 = vsyncadd (%p2812_p8), [#allocation6], 4294959104  ;;  %v2156_v1 = vld [vmem:[#allocation5 + $0xf8] sm:$0xff]   ;;  %1871 = vmatprep.subr.bf16.mxu0 %v2155_v0  ;;  %v2160_v5 = vld [vmem:[#allocation5 + $0xf0] sm:$0xff]   ;;  %s2688_s14 = scalar_lea.vmem [#allocation7], %s1762_s15  ;;  %s1870_s8 = sshll.u32 %s2456_s25, 8 }
  0x4d   : > { %v2157_v2 = vld [vmem:[#allocation5 + $0x38] sm:$0xff]   ;;  %1899 = vmatprep.subr.bf16.mxu1 %v2156_v1  ;;  %v2161_v6 = vld [vmem:[#allocation5 + $0x30] sm:$0xff]   ;;  %v2164_v9 = vld [vmem:[#allocation5 + $0xe8] sm:$0xff]   ;;  %s2718_s29 = scalar_lea.hbm %s2796_s5, %s1870_s8  ;;  %s1627_s12 = sshll.u32 %s2688_s14, 4  ;;  %s2721_s12 = int_to_ptr.vmem [resolvable:$true] %s1627_s12 }
  0x4e   : > { %v2158_v3 = vld [vmem:[#allocation5 + $0xb8] sm:$0xff]   ;;  %1872 = vmatpush3.bf16.msra.mxu0 %v2157_v2  ;;  %v2162_v7 = vld [vmem:[#allocation5 + $0xb0] sm:$0xff]   ;;  %v2165_v10 = vld [vmem:[#allocation5 + $0x28] sm:$0xff]   ;;  %s1609_s7 = scalar_lea.sflag [#allocation4], %s2551_s20  ;;  %s2289_s11 = scalar_lea.vmem %s2721_s12, 256 }
  0x4f   : > { %1900 = vmatpush3.bf16.msra.mxu1 %v2158_v3  ;;  %1873 = vmatprep.subr.bf16.mxu0 %v2159_v4  ;;  %v2166_v11 = vld [vmem:[#allocation5 + $0xa8] sm:$0xff]   ;;  %v2167_v12 = vld [vmem:[#allocation5 + $0x60] sm:$0xff]   ;;  %v2171_v16 = vld [vmem:[#allocation5 + $0x58] sm:$0xff]   ;;  %p2290_p3 = scmp.ne.s32.totalorder %s2721_s12, %s2289_s11  ;;  %p2813_p11 = scmp.ne.s32.totalorder %s2807_s18, 0 }
  0x50   : > { %1901 = vmatprep.subr.bf16.mxu1 %v2160_v5  ;;  %v2168_v13 = vld [vmem:[#allocation5 + $0xe0] sm:$0xff]   ;;  %v2172_v17 = vld [vmem:[#allocation5 + $0xd8] sm:$0xff]   ;;  %v2175_v20 = vld [vmem:[#allocation5 + $0x50] sm:$0xff]   ;;  %s2396_s13 = smov [#allocation7]  }
  0x51   : > { %v2169_v14 = vld [vmem:[#allocation5 + $0x20] sm:$0xff]   ;;  %v2173_v18 = vld [vmem:[#allocation5 + $0x18] sm:$0xff]   ;;  %v2176_v21 = vld [vmem:[#allocation5 + $0xd0] sm:$0xff]   ;;  %p2291_p7 = pnand %p2290_p3, %p2813_p11  ;;  %s2293_s26 = sshll.u32 %s2396_s13, 4  ;;  %s2294_s26 = int_to_ptr.vmem [resolvable:$false] %s2293_s26 }
  0x52   : > { %1874 = vmatpush3.bf16.msra.mxu0 %v2161_v6  ;;  %v2170_v15 = vld [vmem:[#allocation5 + $0xa0] sm:$0xff]   ;;  %v2174_v19 = vld [vmem:[#allocation5 + $0x98] sm:$0xff]   ;;  %v2177_v22 = vld [vmem:[#allocation5 + $0x10] sm:$0xff]   ;;  %s2295_s10 = scalar_lea.vmem %s2294_s26, 512  ;;  %p2296_p10 = scmp.lt.s32.totalorder %s2721_s12, %s2294_s26 }
  0x53   : > { %1902 = vmatpush3.bf16.msra.mxu1 %v2162_v7  ;;  %1875 = vmatprep.subr.bf16.mxu0 %v2163_v8  ;;  %v2178_v23 = vld [vmem:[#allocation5 + $0x90] sm:$0xff]   ;;  %v2179_v24 = vld [vmem:[#allocation5 + $0x48] sm:$0xff]   ;;  %v2183_v28 = vld [vmem:[#allocation5 + $0x40] sm:$0xff]   ;;  %p2292_p12 = pneg %p2291_p7  ;;  %p2297_p2 = scmp.lt.s32.totalorder %s2295_s10, %s2289_s11 }
  0x54   : > { %1903 = vmatprep.subr.bf16.mxu1 %v2164_v9  ;;  %v2180_v25 = vld [vmem:[#allocation5 + $0xc8] sm:$0xff]   ;;  %v2184_v29 = vld [vmem:[#allocation5 + $0xc0] sm:$0xff]   ;;  %v2187_v40 = vld [vmem:[#allocation5 + $0x178] sm:$0xff]  }
  0x55   : > { %v2181_v26 = vld [vmem:[#allocation5 + $0x8] sm:$0xff]   ;;  %v2185_v30 = vld [vmem:[#allocation5] sm:$0xff]   ;;  %v2188_v41 = vld [vmem:[#allocation5 + $0x1f8] sm:$0xff]   ;;  %p2298_p13 = por %p2297_p2, %p2296_p10 }
  0x56   : > { %1876 = vmatpush3.bf16.msra.mxu0 %v2165_v10  ;;  %v2182_v27 = vld [vmem:[#allocation5 + $0x88] sm:$0xff]   ;;  %v2186_v31 = vld [vmem:[#allocation5 + $0x80] sm:$0xff]   ;;  %v2189_v42 = vld [vmem:[#allocation5 + $0x138] sm:$0xff]  }
  0x57   : > { %1904 = vmatpush3.bf16.msra.mxu1 %v2166_v11  ;;  %1877 = vmatprep.subr.bf16.mxu0 %v2167_v12  ;;  %v297_v32 = vld [vmem:[%s2555_s19] sm:$0xff]  ;;  %v298_v34 = vld [vmem:[%s2555_s19 + $0x8] sm:$0xff]  ;;  %v2190_v43 = vld [vmem:[#allocation5 + $0x1b8] sm:$0xff]   ;;  %p2299_p0 = pnand %p2298_p13, %p2292_p12 }
  0x58   : > { %1905 = vmatprep.subr.bf16.mxu1 %v2168_v13  ;;  %v301_v33 = vld [vmem:[%s2555_s19 + $0x20] sm:$0xff]  ;;  %v302_v37 = vld [vmem:[%s2555_s19 + $0x28] sm:$0xff]  ;;  %v2191_v44 = vld [vmem:[#allocation5 + $0x170] sm:$0xff]  }
  0x59   : > { %v1765_v35 = vcombine.low %v297_v32, %v301_v33  ;;  %v1766_v36 = vcombine.high %v297_v32, %v301_v33  ;;  %v1767_v38 = vcombine.low %v298_v34, %v302_v37  ;;  %v1768_v39 = vcombine.high %v298_v34, %v302_v37  ;;  %v2192_v45 = vld [vmem:[#allocation5 + $0x1f0] sm:$0xff]   ;;  %v2195_v48 = vld [vmem:[#allocation5 + $0x168] sm:$0xff]   ;;  %v2199_v52 = vld [vmem:[#allocation5 + $0x160] sm:$0xff]  }
  0x5a   : > { %1878 = vmatpush3.bf16.msra.mxu0 %v2169_v14  ;;  %v2193_v46 = vld [vmem:[#allocation5 + $0x130] sm:$0xff]   ;;  %v2196_v49 = vld [vmem:[#allocation5 + $0x1e8] sm:$0xff]   ;;  %v2200_v53 = vld [vmem:[#allocation5 + $0x1e0] sm:$0xff]  }
  0x5b   : > { %1906 = vmatpush3.bf16.msra.mxu1 %v2170_v15  ;;  %1879 = vmatprep.subr.bf16.mxu0 %v2171_v16  ;;  %v2194_v47 = vld [vmem:[#allocation5 + $0x1b0] sm:$0xff]   ;;  %v2197_v50 = vld [vmem:[#allocation5 + $0x128] sm:$0xff]   ;;  %v2201_v54 = vld [vmem:[#allocation5 + $0x120] sm:$0xff]  }
  0x5c   : > { %1907 = vmatprep.subr.bf16.mxu1 %v2172_v17  ;;  %928 = vmatprep.mubr.bf16.mxu0 %v1766_v36  ;;  %v2198_v51 = vld [vmem:[#allocation5 + $0x1a8] sm:$0xff]   ;;  %v2202_v55 = vld [vmem:[#allocation5 + $0x1a0] sm:$0xff]   ;;  %v2203_v56 = vld [vmem:[#allocation5 + $0x158] sm:$0xff]  }
  0x5d   : > { %976 = vmatprep.mubr.bf16.mxu1 %v1768_v39  ;;  %v2204_v57 = vld [vmem:[#allocation5 + $0x1d8] sm:$0xff]   ;;  %v305_v58 = vld [vmem:[%s2555_s19 + $0x40] sm:$0xff]  ;;  %v306_v63 = vld [vmem:[%s2555_s19 + $0x48] sm:$0xff] }
  0x5e   : > { %1880 = vmatpush3.bf16.msra.mxu0 %v2173_v18  ;;  %v1774_v59 = vcombine.high %v305_v58, %v305_v58  ;;  %v2206_v60 = vld [vmem:[#allocation5 + $0x118] sm:$0xff]   ;;  %v1773_v61 = vcombine.low %v305_v58, %v305_v58  ;;  %v1776_v0 = vcombine.high %v306_v63, %v306_v63  ;;  %v1775_v1 = vcombine.low %v306_v63, %v306_v63  ;;  %v2211_v2 = vld [vmem:[#allocation5 + $0x150] sm:$0xff]   ;;  %v2215_v6 = vld [vmem:[#allocation5 + $0x148] sm:$0xff]  }
  0x5f   : > { %1908 = vmatpush3.bf16.msra.mxu1 %v2174_v19  ;;  %1881 = vmatprep.subr.bf16.mxu0 %v2175_v20  ;;  %v2207_v62 = vld [vmem:[#allocation5 + $0x198] sm:$0xff]   ;;  %v2212_v3 = vld [vmem:[#allocation5 + $0x1d0] sm:$0xff]   ;;  %v2216_v7 = vld [vmem:[#allocation5 + $0x1c8] sm:$0xff]  }
  0x60   : > { %1909 = vmatprep.subr.bf16.mxu1 %v2176_v21  ;;  %v2213_v4 = vld [vmem:[#allocation5 + $0x110] sm:$0xff]   ;;  %v2217_v8 = vld [vmem:[#allocation5 + $0x108] sm:$0xff]   ;;  %v2219_v10 = vld [vmem:[#allocation5 + $0x140] sm:$0xff]  }
  0x61   : > { %v2214_v5 = vld [vmem:[#allocation5 + $0x190] sm:$0xff]   ;;  %v2218_v9 = vld [vmem:[#allocation5 + $0x188] sm:$0xff]   ;;  %v2220_v11 = vld [vmem:[#allocation5 + $0x1c0] sm:$0xff]  }
  0x62   : > { %1882 = vmatpush3.bf16.msra.mxu0 %v2177_v22  ;;  %v2221_v12 = vld [vmem:[#allocation5 + $0x100] sm:$0xff]   ;;  %v299_v14 = vld [vmem:[%s2555_s19 + $0x10] sm:$0xff]  ;;  %v300_v16 = vld [vmem:[%s2555_s19 + $0x18] sm:$0xff] }
  0x63   : > { %1910 = vmatpush3.bf16.msra.mxu1 %v2178_v23  ;;  %1883 = vmatprep.subr.bf16.mxu0 %v2179_v24  ;;  %v2222_v13 = vld [vmem:[#allocation5 + $0x180] sm:$0xff]   ;;  %v303_v15 = vld [vmem:[%s2555_s19 + $0x30] sm:$0xff]  ;;  %v304_v19 = vld [vmem:[%s2555_s19 + $0x38] sm:$0xff] }
  0x64   : > { %1911 = vmatprep.subr.bf16.mxu1 %v2180_v25  ;;  %v1769_v17 = vcombine.low %v299_v14, %v303_v15  ;;  %v1770_v18 = vcombine.high %v299_v14, %v303_v15  ;;  %v307_v20 = vld [vmem:[%s2555_s19 + $0x50] sm:$0xff]  ;;  %v308_v21 = vld [vmem:[%s2555_s19 + $0x58] sm:$0xff]  ;;  %v1771_v22 = vcombine.low %v300_v16, %v304_v19  ;;  %v1772_v23 = vcombine.high %v300_v16, %v304_v19 }
  0x65   : > { %v1778_v24 = vcombine.high %v307_v20, %v307_v20  ;;  %v1780_v25 = vcombine.high %v308_v21, %v308_v21 }
  0x66   : > { %1884 = vmatpush3.bf16.msra.mxu0 %v2181_v26  ;;  %v1777_v26 = vcombine.low %v307_v20, %v307_v20 }
  0x67   : > { %1912 = vmatpush3.bf16.msra.mxu1 %v2182_v27  ;;  %1885 = vmatprep.subr.bf16.mxu0 %v2183_v28  ;;  %v1779_v27 = vcombine.low %v308_v21, %v308_v21  ;;  %v1088_v28 = vld [vmem:[%s2794_s3] sm:$0xff] }
  0x68   : > { %1913 = vmatprep.subr.bf16.mxu1 %v2184_v29 }
  0x6a   : > { %1886 = vmatpush3.bf16.msra.mxu0 %v2185_v30 }
  0x6b   : > { %1914 = vmatpush3.bf16.msra.mxu1 %v2186_v31  ;;  %1927 = vmatprep.subr.bf16.mxu0 %v2187_v40 }
  0x6c   : > { %1955 = vmatprep.subr.bf16.mxu1 %v2188_v41 }
  0x6d   : > { %929 = vmatmul.mubr.bf16.vlgmr.msra.gmra.mxu0 %v1765_v35 }
  0x6e   : > { %977 = vmatmul.mubr.bf16.vlgmr.msra.gmra.mxu1 %v1767_v38  ;;  %1928 = vmatpush3.bf16.msra.mxu0 %v2189_v42 }
  0x6f   : > { %1956 = vmatpush3.bf16.msra.mxu1 %v2190_v43  ;;  %1929 = vmatprep.subr.bf16.mxu0 %v2191_v44 }
  0x70   : > { %1957 = vmatprep.subr.bf16.mxu1 %v2192_v45  ;;  %936 = vmatprep.mubr.bf16.mxu0 %v1774_v59 }
  0x71   : > { %984 = vmatprep.mubr.bf16.mxu1 %v1776_v0 }
  0x72   : > { %1930 = vmatpush3.bf16.msra.mxu0 %v2193_v46  ;;  %v1764_v46 = vld [vmem:[%s2793_s2] ss:$0 sm:$0xff] }
  0x73   : > { %1958 = vmatpush3.bf16.msra.mxu1 %v2194_v47  ;;  %1931 = vmatprep.subr.bf16.mxu0 %v2195_v48 }
  0x74   : > { %1959 = vmatprep.subr.bf16.mxu1 %v2196_v49 }
  0x75   : > { %937 = vmatmul.mubr.bf16.gmra.mxu0 %v1773_v61 }
  0x76   : > { %1932 = vmatpush3.bf16.msra.mxu0 %v2197_v50  ;;  %985 = vmatmul.mubr.bf16.gmra.mxu1 %v1775_v1 }
  0x77   : > { %1960 = vmatpush3.bf16.msra.mxu1 %v2198_v51  ;;  %1933 = vmatprep.subr.bf16.mxu0 %v2199_v52 }
  0x78   : > { %1961 = vmatprep.subr.bf16.mxu1 %v2200_v53  ;;  %1024 = vmatprep.mubr.bf16.mxu0 %v1770_v18  ;;  %v1091_v18 = vld [vmem:[%s2794_s3 + $0x18] sm:$0xff] }
  0x79   : > { %1072 = vmatprep.mubr.bf16.mxu1 %v1772_v23 }
  0x7a   : > { %1934 = vmatpush3.bf16.msra.mxu0 %v2201_v54 }
  0x7b   : > { %1962 = vmatpush3.bf16.msra.mxu1 %v2202_v55  ;;  %1935 = vmatprep.subr.bf16.mxu0 %v2203_v56 }
  0x7c   : > { %1963 = vmatprep.subr.bf16.mxu1 %v2204_v57 }
  0x7e   : > { %1936 = vmatpush3.bf16.msra.mxu0 %v2206_v60 }
  0x7f   : > { %1964 = vmatpush3.bf16.msra.mxu1 %v2207_v62  ;;  %1937 = vmatprep.subr.bf16.mxu0 %v2211_v2 }
  0x80   : > { %1965 = vmatprep.subr.bf16.mxu1 %v2212_v3 }
  0x82   : > { %1938 = vmatpush3.bf16.msra.mxu0 %v2213_v4 }
  0x83   : > { %1966 = vmatpush3.bf16.msra.mxu1 %v2214_v5  ;;  %1939 = vmatprep.subr.bf16.mxu0 %v2215_v6 }
  0x84   : > { %1967 = vmatprep.subr.bf16.mxu1 %v2216_v7  ;;  %v1089_v7 = vld [vmem:[%s2794_s3 + $0x8] sm:$0xff] }
  0x86   : > { %1940 = vmatpush3.bf16.msra.mxu0 %v2217_v8 }
  0x87   : > { %1968 = vmatpush3.bf16.msra.mxu1 %v2218_v9  ;;  %1941 = vmatprep.subr.bf16.mxu0 %v2219_v10 }
  0x88   : > { %1969 = vmatprep.subr.bf16.mxu1 %v2220_v11  ;;  %v1090_v11 = vld [vmem:[%s2794_s3 + $0x10] sm:$0xff] }
  0x8a   : > { %1942 = vmatpush3.bf16.msra.mxu0 %v2221_v12 }
  0x8b   : > { %1970 = vmatpush3.bf16.msra.mxu1 %v2222_v13 }
  0x8d   : > { %1025 = vmatmul.mubr.bf16.vlgmr.msra.gmra.mxu0 %v1769_v17 }
  0x8e   : > { %1073 = vmatmul.mubr.bf16.vlgmr.msra.gmra.mxu1 %v1771_v22  ;;  %1032 = vmatprep.mubr.bf16.mxu0 %v1778_v24  ;;  %v1092_v22 = vld [vmem:[%s2794_s3 + $0x20] sm:$0xff] }
  0x8f   : > { %1080 = vmatprep.mubr.bf16.mxu1 %v1780_v25 }
  0x95   : > { %1033 = vmatmul.mubr.bf16.gmra.mxu0 %v1777_v26 }
  0x96   : > { %1081 = vmatmul.mubr.bf16.gmra.mxu1 %v1779_v27  ;;  %2020 = vmatprep.mubr.msk.f32.mxu0 %vm1104_vm0, %v1088_v28  ;;  %v1093_v27 = vld [vmem:[%s2794_s3 + $0x28] sm:$0xff] }
 0x12d   : > { %v1887_v29 = vpop.f32.mrf.mxu0 }
 0x12e   : > { %v1915_v30 = vpop.f32.mrf.mxu1 }
 0x12f   : > { %v1888_v31 = vpop.f32.mrf.mxu0 }
 0x130   : > { %v1916_v32 = vpop.f32.mrf.mxu1  ;;  %v1889_v45 = vadd.f32 %v1888_v31, %v1887_v29  ;;  %v1094_v29 = vld [vmem:[%s2794_s3 + $0x30] sm:$0xff]  ;;  %v1096_v31 = vld [vmem:[%s2794_s3 + $0x40] sm:$0xff] }
 0x131   : > { %v1890_v33 = vpop.f32.mrf.mxu0  ;;  %v1917_v49 = vadd.f32 %v1916_v32, %v1915_v30  ;;  %v1095_v30 = vld [vmem:[%s2794_s3 + $0x38] sm:$0xff]  ;;  %v1097_v32 = vld [vmem:[%s2794_s3 + $0x48] sm:$0xff] }
 0x132   : > { %v1918_v34 = vpop.f32.mrf.mxu1  ;;  %v931_v48 = vadd.f32 %v1889_v45, %v1764_v46 }
 0x133   : > { %v1891_v35 = vpop.f32.mrf.mxu0 }
 0x134   : > { %v1919_v36 = vpop.f32.mrf.mxu1  ;;  %v1892_v47 = vadd.f32 %v1891_v35, %v1890_v33  ;;  %v979_v54 = vadd.f32 %v1917_v49, %v931_v48  ;;  %v1098_v33 = vld [vmem:[%s2794_s3 + $0x50] sm:$0xff]  ;;  %v1100_v35 = vld [vmem:[%s2794_s3 + $0x60] sm:$0xff] }
 0x135   : > { %v1893_v37 = vpop.f32.mrf.mxu0  ;;  %v1920_v58 = vadd.f32 %v1919_v36, %v1918_v34  ;;  %v1099_v34 = vld [vmem:[%s2794_s3 + $0x58] sm:$0xff]  ;;  %v1101_v36 = vld [vmem:[%s2794_s3 + $0x68] sm:$0xff] }
 0x136   : > { %v1921_v39 = vpop.f32.mrf.mxu1  ;;  %v934_v52 = vadd.f32 %v1892_v47, %v1764_v46 }
 0x137   : > { %v1894_v38 = vpop.f32.mrf.mxu0 }
 0x138   : > { %v1922_v41 = vpop.f32.mrf.mxu1  ;;  %v1895_v55 = vadd.f32 %v1894_v38, %v1893_v37  ;;  %v982_v63 = vadd.f32 %v1920_v58, %v934_v52  ;;  %v1102_v37 = vld [vmem:[%s2794_s3 + $0x70] sm:$0xff]  ;;  %v1103_v38 = vld [vmem:[%s2794_s3 + $0x78] sm:$0xff] }
 0x139   : > { %v1896_v40 = vpop.f32.mrf.mxu0  ;;  %v1923_v2 = vadd.f32 %v1922_v41, %v1921_v39 }
 0x13a   : > { %v1924_v43 = vpop.f32.mrf.mxu1  ;;  %v939_v1 = vadd.f32 %v1895_v55, %v1764_v46 }
 0x13b   : > { %v1897_v42 = vpop.f32.mrf.mxu0 }
 0x13c   : > { %v1925_v44 = vpop.f32.mrf.mxu1  ;;  %v987_v13 = vadd.f32 %v1923_v2, %v939_v1 }
 0x14d   : > { %v1943_v50 = vpop.f32.mrf.mxu0 }
 0x14e   : > { %v1971_v51 = vpop.f32.mrf.mxu1 }
 0x14f   : > { %v1944_v53 = vpop.f32.mrf.mxu0 }
 0x150   : > { %v1945_v56 = vadd.f32 %v1944_v53, %v1943_v50  ;;  %v1972_v57 = vpop.f32.mrf.mxu1 }
 0x151   : > { %v1946_v59 = vpop.f32.mrf.mxu0  ;;  %v1973_v61 = vadd.f32 %v1972_v57, %v1971_v51 }
 0x152   : > { %v1027_v60 = vadd.f32 %v1945_v56, %v979_v54  ;;  %v1974_v62 = vpop.f32.mrf.mxu1 }
 0x153   : > { %v1947_v0 = vpop.f32.mrf.mxu0 }
 0x154   : > { %v1075_v3 = vadd.f32 %v1973_v61, %v1027_v60  ;;  %v1948_v4 = vadd.f32 %v1947_v0, %v1946_v59  ;;  %v1975_v5 = vpop.f32.mrf.mxu1 }
 0x155   : > { %v1949_v6 = vpop.f32.mrf.mxu0  ;;  %v1976_v9 = vadd.f32 %v1975_v5, %v1974_v62 }
 0x156   : > { %v1030_v8 = vadd.f32 %v1948_v4, %v982_v63  ;;  %2018 = vmatprep.subr.mxu0 %v1075_v3  ;;  %v1977_v10 = vpop.f32.mrf.mxu1 }
 0x157   : > { %v1950_v12 = vpop.f32.mrf.mxu0  ;;  %2019 = vmatpush3.msra.mxu0 %v1075_v3 }
 0x158   : > { %v1078_v14 = vadd.f32 %v1976_v9, %v1030_v8  ;;  %v1951_v15 = vadd.f32 %v1950_v12, %v1949_v6  ;;  %2021 = vmatmul.mubr.msk.f32.vlgmr.msra.gmra.mxu0 %vm1104_vm0, %v1089_v7  ;;  %v1978_v16 = vpop.f32.mrf.mxu1 }
 0x159   : > { %v1979_v17 = vadd.f32 %v1978_v16, %v1977_v10  ;;  %2023 = vmatprep.mubr.msk.f32.mxu0 %vm1104_vm0, %v1090_v11  ;;  %v1952_v19 = vpop.f32.mrf.mxu0 }
 0x15a   : > { %v1035_v20 = vadd.f32 %v1951_v15, %v987_v13  ;;  %2076 = vmatprep.mubr.f32.mxu1 %v1078_v14  ;;  %v1442_v21 = vmul.f32 %v1078_v14, %v1078_v14  ;;  %v1980_v23 = vpop.f32.mrf.mxu1 }
 0x15b   : > { %v1953_v24 = vpop.f32.mrf.mxu0 }
 0x15c   : > { %v2598_v25 = vadd.f32 %v1979_v17, %v1035_v20  ;;  %1444 = vadd.xlane.f32.xlu1 %v1442_v21  ;;  %2024 = vmatmul.mubr.msk.f32.gmra.mxu0 %vm1104_vm0, %v1091_v18  ;;  %v1981_v26 = vpop.f32.mrf.mxu1 }
 0x15d   : > { %2026 = vmatprep.mubr.msk.f32.mxu0 %vm1104_vm0, %v1092_v22 }
 0x15e   : > { %v1443_v28 = vmul.f32 %v2598_v25, %v2598_v25 }
 0x160   : > { %1446 = vadd.xlane.f32.xlu1 %v1443_v28  ;;  %2027 = vmatmul.mubr.msk.f32.gmra.mxu0 %vm1104_vm0, %v1093_v27 }
 0x161   : > { %2029 = vmatprep.mubr.msk.f32.mxu0 %vm1104_vm0, %v1094_v29 }
 0x164   : > { %2030 = vmatmul.mubr.msk.f32.gmra.mxu0 %vm1104_vm0, %v1095_v30 }
 0x165   : > { %2032 = vmatprep.mubr.msk.f32.mxu0 %vm1104_vm0, %v1096_v31 }
 0x168   : > { %2033 = vmatmul.mubr.msk.f32.gmra.mxu0 %vm1104_vm0, %v1097_v32 }
 0x169   : > { %2035 = vmatprep.mubr.msk.f32.mxu0 %vm1104_vm0, %v1098_v33 }
 0x16c   : > { %2036 = vmatmul.mubr.msk.f32.gmra.mxu0 %vm1104_vm0, %v1099_v34 }
 0x16d   : > { %2038 = vmatprep.mubr.msk.f32.mxu0 %vm1104_vm0, %v1100_v35 }
 0x170   : > { %2039 = vmatmul.mubr.msk.f32.gmra.mxu0 %vm1104_vm0, %v1101_v36 }
 0x171   : > { %2041 = vmatprep.mubr.msk.f32.mxu0 %vm1104_vm0, %v1102_v37  ;;  %v2676_v37 = vld [vmem:[%s2795_s4] sm:$0xff] }
 0x172   : > { %vm1525_vm2 = vcmp.gt.f32.partialorder %v2676_v37, 0.5 }
 0x174   : > { %2042 = vmatmul.mubr.msk.f32.gmra.mxu0 %vm1104_vm0, %v1103_v38 }
 0x218   : > { %v2022_v39 = vpop.f32.mrf.mxu0 }
 0x21a   : > { %v1219_v40 = vpop.f32.mrf.mxu0 }
 0x21b   : > { %1298 = vxpose.xlu0.b32.start [1/16] %v1219_v40, 128 }
 0x21c   : > { %v2025_v41 = vpop.f32.mrf.mxu0 }
 0x21e   : > { %v1229_v42 = vpop.f32.mrf.mxu0 }
 0x21f   : > { %1299 = vxpose.xlu0.b32.cont [2/16] %v2022_v39, 128 }
 0x220   : > { %v2028_v43 = vpop.f32.mrf.mxu0 }
 0x222   : > { %v1239_v44 = vpop.f32.mrf.mxu0 }
 0x223   : > { %1300 = vxpose.xlu0.b32.cont [3/16] %v1229_v42, 128 }
 0x224   : > { %v2031_v45 = vpop.f32.mrf.mxu0 }
 0x226   : > { %v1249_v46 = vpop.f32.mrf.mxu0 }
 0x227   : > { %1301 = vxpose.xlu0.b32.cont [4/16] %v2025_v41, 128 }
 0x228   : > { %v2034_v47 = vpop.f32.mrf.mxu0 }
 0x22a   : > { %v1259_v48 = vpop.f32.mrf.mxu0 }
 0x22b   : > { %1302 = vxpose.xlu0.b32.cont [5/16] %v1239_v44, 128  ;;  %v1445_v44 = vpop.xlane.xlu1 %1444 }
 0x22c   : > { %v2037_v49 = vpop.f32.mrf.mxu0 }
 0x22e   : > { %v1269_v50 = vpop.f32.mrf.mxu0 }
 0x22f   : > { %1303 = vxpose.xlu0.b32.cont [6/16] %v2028_v43, 128 }
 0x230   : > { %v2040_v51 = vpop.f32.mrf.mxu0 }
 0x232   : > { %v1279_v52 = vpop.f32.mrf.mxu0 }
 0x233   : > { %1304 = vxpose.xlu0.b32.cont [7/16] %v1249_v46, 128 }
 0x234   : > { %v2043_v53 = vpop.f32.mrf.mxu0 }
 0x236   : > { %v1289_v54 = vpop.f32.mrf.mxu0 }
 0x237   : > { %1305 = vxpose.xlu0.b32.cont [8/16] %v2031_v45, 128  ;;  %v1454_v45 = vlaneseq }
 0x23b   : > { %1306 = vxpose.xlu0.b32.cont [9/16] %v1259_v48, 128 }
 0x23f   : > { %1307 = vxpose.xlu0.b32.cont [10/16] %v2034_v47, 128 }
 0x243   : > { %1308 = vxpose.xlu0.b32.cont [11/16] %v1269_v50, 128 }
 0x247   : > { %1309 = vxpose.xlu0.b32.cont [12/16] %v2037_v49, 128  ;;  %v1447_v49 = vpop.xlane.xlu1 %1446 }
 0x24b   : > { %1310 = vxpose.xlu0.b32.cont [13/16] %v1279_v52, 128 }
 0x24f   : > { %1311 = vxpose.xlu0.b32.cont [14/16] %v2040_v51, 128 }
 0x253   : > { %1312 = vxpose.xlu0.b32.cont [15/16] %v1289_v54, 128 }
 0x257   : > { %1313 = vxpose.xlu0.b32.end [16/16] %v2043_v53, 128 }
 0x284   : > { %1463 = vadd.xlane.f32.xlu0 %v2676_v37 }
 0x297   : > { %v2648_v55 = vpop.trf.xlu0 }
 0x298   : > { %v1405_v60 = vmul.f32 %v2648_v55, %v2648_v55 }
 0x29b   : > { %v2650_v56 = vpop.trf.xlu0 }
 0x29c   : > { %v1406_v59 = vmul.f32 %v2650_v56, %v2650_v56 }
 0x29e   : > { %v1421_v63 = vadd.f32 %v1406_v59, %v1405_v60 }
 0x29f   : > { %v2652_v57 = vpop.trf.xlu0 }
 0x2a0   : > { %v1407_v61 = vmul.f32 %v2652_v57, %v2652_v57 }
 0x2a2   : > { %v1422_v1 = vadd.f32 %v1421_v63, %v1407_v61 }
 0x2a3   : > { %v2654_v58 = vpop.trf.xlu0 }
 0x2a4   : > { %v1408_v0 = vmul.f32 %v2654_v58, %v2654_v58 }
 0x2a6   : > { %v1423_v4 = vadd.f32 %v1422_v1, %v1408_v0  ;;  %v1462_v0 = vld [vmem:[%s2795_s4 + $0x8] sm:$0xff] }
 0x2a7   : > { %v1318_v62 = vpop.trf.xlu0  ;;  %vm1526_vm5 = vcmp.gt.f32.partialorder %v1462_v0, 0.5 }
 0x2a8   : > { %v1409_v2 = vmul.f32 %v1318_v62, %v1318_v62 }
 0x2aa   : > { %v1424_v6 = vadd.f32 %v1423_v4, %v1409_v2 }
 0x2ab   : > { %v1319_v3 = vpop.trf.xlu0 }
 0x2ac   : > { %v1410_v5 = vmul.f32 %v1319_v3, %v1319_v3 }
 0x2ae   : > { %v1425_v8 = vadd.f32 %v1424_v6, %v1410_v5 }
 0x2af   : > { %v1320_v7 = vpop.trf.xlu0 }
 0x2b0   : > { %v1411_v9 = vmul.f32 %v1320_v7, %v1320_v7 }
 0x2b2   : > { %v1426_v10 = vadd.f32 %v1425_v8, %v1411_v9 }
 0x2b3   : > { %v1321_v11 = vpop.trf.xlu0 }
 0x2b4   : > { %v1412_v12 = vmul.f32 %v1321_v11, %v1321_v11 }
 0x2b6   : > { %v1427_v13 = vadd.f32 %v1426_v10, %v1412_v12 }
 0x2b7   : > { %v1322_v14 = vpop.trf.xlu0 }
 0x2b8   : > { %v1413_v15 = vmul.f32 %v1322_v14, %v1322_v14 }
 0x2ba   : > { %v1428_v16 = vadd.f32 %v1427_v13, %v1413_v15 }
 0x2bb   : > { %v1323_v17 = vpop.trf.xlu0 }
 0x2bc   : > { %v1414_v18 = vmul.f32 %v1323_v17, %v1323_v17 }
 0x2be   : > { %v1429_v19 = vadd.f32 %v1428_v16, %v1414_v18 }
 0x2bf   : > { %v1324_v20 = vpop.trf.xlu0 }
 0x2c0   : > { %v1415_v21 = vmul.f32 %v1324_v20, %v1324_v20 }
 0x2c2   : > { %v1430_v22 = vadd.f32 %v1429_v19, %v1415_v21 }
 0x2c3   : > { %v1325_v23 = vpop.trf.xlu0 }
 0x2c4   : > { %v1416_v24 = vmul.f32 %v1325_v23, %v1325_v23 }
 0x2c6   : > { %v1431_v26 = vadd.f32 %v1430_v22, %v1416_v24 }
 0x2c7   : > { %v1326_v27 = vpop.trf.xlu0 }
 0x2c8   : > { %v1417_v28 = vmul.f32 %v1326_v27, %v1326_v27 }
 0x2ca   : > { %v1432_v29 = vadd.f32 %v1431_v26, %v1417_v28 }
 0x2cb   : > { %v1327_v30 = vpop.trf.xlu0 }
 0x2cc   : > { %v1418_v31 = vmul.f32 %v1327_v30, %v1327_v30 }
 0x2ce   : > { %v1433_v32 = vadd.f32 %v1432_v29, %v1418_v31 }
 0x2cf   : > { %v1328_v33 = vpop.trf.xlu0 }
 0x2d0   : > { %v1419_v34 = vmul.f32 %v1328_v33, %v1328_v33 }
 0x2d2   : > { %v1434_v35 = vadd.f32 %v1433_v32, %v1419_v34 }
 0x2d3   : > { %v1329_v36 = vpop.trf.xlu0 }
 0x2d4   : > { %2044 = vmatprep.subr.mxu1 %v1329_v36  ;;  %v1420_v38 = vmul.f32 %v1329_v36, %v1329_v36 }
 0x2d5   : > { %2045 = vmatpush3.msra.mxu1 %v1329_v36 }
 0x2d6   : > { %2046 = vmatprep.subr.mxu1 %v1328_v33  ;;  %v1435_v39 = vadd.f32 %v1434_v35, %v1420_v38 }
 0x2d7   : > { %2047 = vmatpush3.msra.mxu1 %v1328_v33 }
 0x2d8   : > { %2048 = vmatprep.subr.mxu1 %v1327_v30  ;;  %v1436_v40 = vrot.slane %v1435_v39, 4 }
 0x2d9   : > { %2049 = vmatpush3.msra.mxu1 %v1327_v30 }
 0x2da   : > { %2050 = vmatprep.subr.mxu1 %v1326_v27  ;;  %v1437_v41 = vadd.f32 %v1436_v40, %v1435_v39 }
 0x2db   : > { %2051 = vmatpush3.msra.mxu1 %v1326_v27 }
 0x2dc   : > { %2052 = vmatprep.subr.mxu1 %v1325_v23  ;;  %v1438_v42 = vrot.slane %v1437_v41, 2 }
 0x2dd   : > { %2053 = vmatpush3.msra.mxu1 %v1325_v23 }
 0x2de   : > { %2054 = vmatprep.subr.mxu1 %v1324_v20  ;;  %v1439_v43 = vadd.f32 %v1438_v42, %v1437_v41 }
 0x2df   : > { %2055 = vmatpush3.msra.mxu1 %v1324_v20 }
 0x2e0   : > { %2056 = vmatprep.subr.mxu1 %v1323_v17  ;;  %v1440_v46 = vrot.slane %v1439_v43, 1 }
 0x2e1   : > { %2057 = vmatpush3.msra.mxu1 %v1323_v17 }
 0x2e2   : > { %2058 = vmatprep.subr.mxu1 %v1322_v14  ;;  %v1441_v51 = vadd.f32 %v1440_v46, %v1439_v43 }
 0x2e3   : > { %2059 = vmatpush3.msra.mxu1 %v1322_v14 }
 0x2e4   : > { %2060 = vmatprep.subr.mxu1 %v1321_v11 }
 0x2e5   : > { %2061 = vmatpush3.msra.mxu1 %v1321_v11 }
 0x2e6   : > { %2062 = vmatprep.subr.mxu1 %v1320_v7 }
 0x2e7   : > { %2063 = vmatpush3.msra.mxu1 %v1320_v7 }
 0x2e8   : > { %2064 = vmatprep.subr.mxu1 %v1319_v3 }
 0x2e9   : > { %2065 = vmatpush3.msra.mxu1 %v1319_v3 }
 0x2ea   : > { %2066 = vmatprep.subr.mxu1 %v1318_v62 }
 0x2eb   : > { %2067 = vmatpush3.msra.mxu1 %v1318_v62 }
 0x2ec   : > { %2068 = vmatprep.subr.mxu1 %v2654_v58 }
 0x2ed   : > { %2069 = vmatpush3.msra.mxu1 %v2654_v58 }
 0x2ee   : > { %2070 = vmatprep.subr.mxu1 %v2652_v57 }
 0x2ef   : > { %2071 = vmatpush3.msra.mxu1 %v2652_v57 }
 0x2f0   : > { %2072 = vmatprep.subr.mxu1 %v2650_v56 }
 0x2f1   : > { %2073 = vmatpush3.msra.mxu1 %v2650_v56 }
 0x2f2   : > { %2074 = vmatprep.subr.mxu1 %v2648_v55 }
 0x2f3   : > { %2075 = vmatpush3.msra.mxu1 %v2648_v55 }
 0x2f4   : > { %2077 = vmatmul.mubr.f32.vlgmr.msra.gmra.mxu1 %v2598_v25  ;;  %v2680_v25 = vand.u32 127, %v1454_v45 }
 0x2f6   : > { %vm1456_vm1 = vcmp.lt.s32.totalorder %v2680_v25, 4  ;;  %v1527_v58 = vsel %vm1525_vm2, %v2680_v25, 128  ;;  %v1528_v4 = vsel %vm1526_vm5, %v2680_v25, 128 }
 0x2f7   : > { %v1530_v60 = vshra.s32 %v1527_v58, 16  ;;  %v1544_v7 = vshra.s32 %v1528_v4, 16  ;;  %v1529_v8 = vand.u32 65535, %v1527_v58  ;;  %v1543_v19 = vand.u32 65535, %v1528_v4 }
 0x2f9   : > { %v1532_v61 = vcvt.s32.f32 %v1530_v60  ;;  %v1546_v11 = vcvt.s32.f32 %v1544_v7  ;;  %v1531_v12 = vcvt.s32.f32 %v1529_v8  ;;  %v1545_v21 = vcvt.s32.f32 %v1543_v19 }
 0x3b4   : > { %v2078_v47 = vpop.f32.mrf.mxu1 }
 0x3b5   : > { %v1449_v48 = vmul.f32 2.0, %v2078_v47 }
 0x3b6   : > { %v1396_v50 = vpop.f32.mrf.mxu1 }
 0x3b7   : > { %v1451_v52 = vsub.f32 %v1449_v48, %v1447_v49  ;;  %v1448_v53 = vmul.f32 2.0, %v1396_v50 }
 0x3b9   : > { %v1453_v54 = vsub.f32 %v1451_v52, %v1441_v51  ;;  %v1450_v55 = vsub.f32 %v1448_v53, %v1445_v44 }
 0x3bb   : > { %v1452_v56 = vsub.f32 %v1450_v55, %v1441_v51  ;;  %v2685_v57 = vsel %vm1456_vm1, %v1453_v54, -1e+30 }
 0x3bc   : > { %1460 = vst [vmem:[%s2688_s14 + $0x8] sm:$0xff] %v2685_v57  ;;  %v1488_v34 = vmul.f32 %v1462_v0, %v2685_v57 }
 0x3bd   : > { %v1457_v59 = vsel %vm1456_vm1, %v1452_v56, -1e+30 }
 0x3be   : > { %1467 = vmax.xlane.f32.xlu1 %v1457_v59  ;;  %1459 = vst [vmem:[%s2688_s14] sm:$0xff] %v1457_v59  ;;  %v1487_v28 = vmul.f32 %v2676_v37, %v1457_v59 }
 0x3c2   : > { %1469 = vmax.xlane.f32.xlu1 %v2685_v57 }
 0x3c6   : > { %1533 = vmin.xlane.f32.xlu1 %v1532_v61 }
 0x447   : > { %v2694_v62 = vpop.xlane.xlu1 %1467 }
 0x448   : > { %vm1493_vm3 = vcmp.eq.f32.partialorder %v1457_v59, %v2694_v62  ;;  %v1471_v15 = vsub.f32 %v1457_v59, %v2694_v62 }
 0x449   : > { %v1495_v2 = vsel %vm1493_vm3, %v2680_v25, 128 }
 0x44a   : > { %v1498_v6 = vshra.s32 %v1495_v2, 16  ;;  %v1473_v18 = vmul.f32 1.442695, %v1471_v15  ;;  %v1497_v30 = vand.u32 65535, %v1495_v2  ;;  %v1464_v2 = vpop.xlane.xlu0 %1463 }
 0x44b   : > { %v2697_v63 = vpop.xlane.xlu1 %1469 }
 0x44c   : > { %vm1494_vm4 = vcmp.eq.f32.partialorder %v2685_v57, %v2697_v63  ;;  %v1500_v9 = vcvt.s32.f32 %v1498_v6  ;;  %v1472_v14 = vsub.f32 %v2685_v57, %v2697_v63  ;;  %v1499_v32 = vcvt.s32.f32 %v1497_v30 }
 0x44d   : > { %v1496_v1 = vsel %vm1494_vm4, %v2680_v25, 128 }
 0x44e   : > { %v1512_v3 = vshra.s32 %v1496_v1, 16  ;;  %v1475_v16 = vmul.f32 1.442695, %v1472_v14  ;;  %v1511_v27 = vand.u32 65535, %v1496_v1 }
 0x44f   : > { %v1534_v10 = vpop.xlane.xlu1 %1533 }
 0x450   : > { %v1514_v5 = vcvt.s32.f32 %v1512_v3  ;;  %vm1535_vm6 = vcmp.eq.f32.partialorder %v1532_v61, %v1534_v10  ;;  %2227 = vpow2.f32 %v1475_v16  ;;  %v1513_v29 = vcvt.s32.f32 %v1511_v27 }
 0x451   : > { %v1536_v13 = vsel %vm1535_vm6, %v1531_v12, inf  ;;  %2229 = vpow2.f32 %v1473_v18  ;;  %v1540_v43 = vcvt.f32.s32 %v1534_v10 }
 0x452   : > { %1515 = vmin.xlane.f32.xlu1 %v1514_v5 }
 0x453   : > { %v1541_v54 = vshll.u32 %v1540_v43, 16 }
 0x456   : > { %1501 = vmin.xlane.f32.xlu1 %v1500_v9 }
 0x45a   : > { %1547 = vmin.xlane.f32.xlu1 %v1546_v11 }
 0x45d   : > { %v2228_v24 = vpop.eup %2227 }
 0x45e   : > { %1537 = vmin.xlane.f32.xlu1 %v1536_v13  ;;  %v2230_v26 = vpop.eup %2229 }
 0x4db   : > { %v1516_v17 = vpop.xlane.xlu1 %1515 }
 0x4dc   : > { %vm1517_vm8 = vcmp.eq.f32.partialorder %v1514_v5, %v1516_v17  ;;  %v1522_v40 = vcvt.f32.s32 %v1516_v17  ;;  %v2395_v5 = vmov 0.0  }
 0x4dd   : > { %v1518_v31 = vsel %vm1517_vm8, %v1513_v29, inf }
 0x4de   : > { %v1523_v46 = vshll.u32 %v1522_v40, 16 }
 0x4df   : > { %v1502_v20 = vpop.xlane.xlu1 %1501 }
 0x4e0   : > { %vm1503_vm9 = vcmp.eq.f32.partialorder %v1500_v9, %v1502_v20  ;;  %v1508_v47 = vcvt.f32.s32 %v1502_v20 }
 0x4e1   : > { %v1504_v33 = vsel %vm1503_vm9, %v1499_v32, inf }
 0x4e2   : > { %v1509_v56 = vshll.u32 %v1508_v47, 16 }
 0x4e3   : > { %v1548_v22 = vpop.xlane.xlu1 %1547 }
 0x4e4   : > { %vm1549_vm7 = vcmp.eq.f32.partialorder %v1546_v11, %v1548_v22  ;;  %v1554_v41 = vcvt.f32.s32 %v1548_v22 }
 0x4e5   : > { %v1550_v23 = vsel %vm1549_vm7, %v1545_v21, inf }
 0x4e6   : > { %1551 = vmin.xlane.f32.xlu1 %v1550_v23  ;;  %v1555_v48 = vshll.u32 %v1554_v41, 16 }
 0x4e7   : > { %v1538_v35 = vpop.xlane.xlu1 %1537 }
 0x4e8   : > { %v1539_v51 = vcvt.f32.s32 %v1538_v35 }
 0x4ea   : > { %1479 = vadd.xlane.f32.xlu1 %v2228_v24  ;;  %v1542_v60 = vadd.s32 %v1541_v54, %v1539_v51 }
 0x4ee   : > { %1477 = vadd.xlane.f32.xlu1 %v2230_v26 }
 0x4f2   : > { %1489 = vadd.xlane.f32.xlu1 %v1487_v28 }
 0x4f6   : > { %1519 = vmin.xlane.f32.xlu1 %v1518_v31 }
 0x4fa   : > { %1505 = vmin.xlane.f32.xlu1 %v1504_v33 }
 0x4fe   : > { %1491 = vadd.xlane.f32.xlu1 %v1488_v34 }
 0x502   : > { %1465 = vadd.xlane.f32.xlu1 %v1462_v0 }
 0x56f   : > { %v1552_v36 = vpop.xlane.xlu1 %1551 }
 0x570   : > { %v1553_v42 = vcvt.f32.s32 %v1552_v36 }
 0x572   : > { %v1556_v52 = vadd.s32 %v1555_v48, %v1553_v42 }
 0x573   : > { %v1480_v38 = vpop.xlane.xlu1 %1479 }
 0x574   : > { %2231 = vlog2.f32 %v1480_v38 }
 0x577   : > { %v1478_v39 = vpop.xlane.xlu1 %1477 }
 0x578   : > { %2233 = vlog2.f32 %v1478_v39 }
 0x57b   : > { %v1490_v37 = vpop.xlane.xlu1 %1489 }
 0x57f   : > { %v1520_v44 = vpop.xlane.xlu1 %1519 }
 0x580   : > { %v1521_v49 = vcvt.f32.s32 %v1520_v44 }
 0x581   : > { %v2232_v50 = vpop.eup %2231 }
 0x582   : > { %v1524_v53 = vadd.s32 %v1523_v46, %v1521_v49  ;;  %v1484_v57 = vmul.f32 0.6931472, %v2232_v50 }
 0x583   : > { %v1506_v55 = vpop.xlane.xlu1 %1505 }
 0x584   : > { %v1507_v58 = vcvt.f32.s32 %v1506_v55  ;;  %vm1558_vm10 = vcmp.eq.s32.totalorder %v1524_v53, %v1556_v52  ;;  %v1486_v4 = vadd.f32 %v1484_v57, %v2697_v63 }
 0x585   : > { %v2234_v59 = vpop.eup %2233  ;;  %v1862_v10 = vsel %vm1558_vm10, 1.0, %v2395_v5 }
 0x586   : > { %v1482_v61 = vmul.f32 0.6931472, %v2234_v59  ;;  %v1510_v0 = vadd.s32 %v1509_v56, %v1507_v58 }
 0x587   : > { %v1492_v1 = vpop.xlane.xlu1 %1491 }
 0x588   : > { %v1485_v3 = vadd.f32 %v1482_v61, %v2694_v62  ;;  %vm1557_vm11 = vcmp.eq.s32.totalorder %v1510_v0, %v1542_v60  ;;  %v1566_v8 = vsub.f32 %v1486_v4, %v1492_v1 }
 0x589   : > { %v1861_v6 = vsel %vm1557_vm11, 1.0, %v2395_v5 }
 0x58a   : > { %v1565_v7 = vsub.f32 %v1485_v3, %v1490_v37  ;;  %v1563_v9 = vmul.f32 %v1861_v6, %v1464_v2 }
 0x58b   : > { %v1466_v11 = vpop.xlane.xlu1 %1465 }
 0x58c   : > { %v1567_v12 = vmul.f32 %v1565_v7, %v1464_v2  ;;  %v1564_v13 = vmul.f32 %v1862_v10, %v1466_v11  ;;  %v1568_v14 = vmul.f32 %v1566_v8, %v1466_v11  ;;  %v1583_v16 = vsel %vm1569_vm12, %v1563_v9, 0.0 }
 0x58e   : > { %v1570_v15 = vsel %vm1569_vm12, %v1567_v12, 0.0  ;;  %v1571_v62 = vsel %vm1569_vm12, %v1568_v14, 0.0  ;;  %v1584_v63 = vsel %vm1569_vm12, %v1564_v13, 0.0 }
 0x58f   : > { %v1572_v17 = vadd.f32 %v1571_v62, %v1570_v15  ;;  %v1585_v18 = vadd.f32 %v1584_v63, %v1583_v16 }
 0x591   : > { %1573 = vadd.xlane.f32.xlu1 %v1572_v17 }
 0x595   : > { %1586 = vadd.xlane.f32.xlu1 %v1585_v18 }
 0x596   : > { %2302 = shalt.err (!%p2299_p0)
}
 0x597   : > { %s2303_s15 = scalar_lea.hbm %s2718_s29, 256  ;;  %s2307_s30 = scalar_lea.hbm %s2796_s5, 512 }
 0x598   : > { %p2304_p5 = scmp.ne.s32.totalorder %s2718_s29, %s2303_s15  ;;  %p2308_p4 = scmp.lt.s32.totalorder %s2718_s29, %s2796_s5 }
 0x599   : > { %p2309_p6 = scmp.lt.s32.totalorder %s2307_s30, %s2303_s15 }
 0x59a   : > { %p2305_p9 = pnand %p2304_p5, %p2813_p11 }
 0x59b   : > { %p2310_p8 = por %p2309_p6, %p2308_p4 }
 0x59c   : > { %p2306_p1 = pneg %p2305_p9 }
 0x59e   : > { %p2311_p3 = pnand %p2310_p8, %p2306_p1 }
 0x5a0   : > { %2314 = shalt.err (!%p2311_p3)
}
 0x5a1   : > { %s2397_s27 = smov 128   ;;  %s2398_s11 = smov 8   ;;  %v1597_v34 = vshrl.u32 %v1454_v45, 7  ;;  %vm1601_vm14 = vcmp.eq.s32.totalorder %v2680_v25, 1  ;;  %vm1599_vm15 = vcmp.eq.s32.totalorder %v2680_v25, 0 }
 0x5a2   : > { %2092 = dma.vmem_to_hbm [thread:$0]  (%p2813_p11), %s2721_s12, 256, %s2718_s29, %s1609_s7, %s2397_s27, %s2397_s27, %s2398_s11  }
 0x5a3   : > { %s1763_s29 = sshll.u32 %s2551_s20, 3  ;;  %vm1598_vm13 = vcmp.eq.s32.totalorder %v1597_v34, 0  ;;  %s1867_s7 = sshll.u32 %s2456_s25, 7 }
 0x5a4   : > { %vm1602_vm0 = vmand %vm1598_vm13, %vm1601_vm14  ;;  %s295_s15 = scalar_lea.vmem [#allocation8], %s1763_s29  ;;  %s2754_s8 = scalar_lea.hbm %s2797_s6, %s1867_s7 }
 0x5a5   : > { %s1643_s14 = sshll.u32 %s295_s15, 4  ;;  %vm1600_vm1 = vmand %vm1598_vm13, %vm1599_vm15  ;;  %s1614_s25 = scalar_lea.sflag [#allocation9], %s2551_s20  ;;  %s1644_s14 = int_to_ptr.vmem [resolvable:$true] %s1643_s14 }
 0x5a6   : > { %s2315_s19 = scalar_lea.vmem %s1644_s14, 128  ;;  %s2399_s27 = smov [#allocation8]  }
 0x5a7   : > { %p2316_p7 = scmp.ne.s32.totalorder %s1644_s14, %s2315_s19  ;;  %s2319_s11 = sshll.u32 %s2399_s27, 4  ;;  %s2320_s11 = int_to_ptr.vmem [resolvable:$false] %s2319_s11 }
 0x5a8   : > { %s2321_s29 = scalar_lea.vmem %s2320_s11, 256  ;;  %p2322_p2 = scmp.lt.s32.totalorder %s1644_s14, %s2320_s11 }
 0x5a9   : > { %p2317_p12 = pnand %p2316_p7, %p2813_p11  ;;  %p2323_p13 = scmp.lt.s32.totalorder %s2321_s29, %s2315_s19 }
 0x5ab   : > { %p2318_p10 = pneg %p2317_p12  ;;  %p2324_p0 = por %p2323_p13, %p2322_p2 }
 0x5ad   : > { %p2325_p5 = pnand %p2324_p0, %p2318_p10 }
 0x61a   : > { %v1574_v19 = vpop.xlane.xlu1 %1573 }
 0x61b   : > { %v1575_v20 = vrot.slane %v1574_v19, 4 }
 0x61d   : > { %v1576_v21 = vadd.f32 %v1575_v20, %v1574_v19 }
 0x61e   : > { %v1587_v22 = vpop.xlane.xlu1 %1586 }
 0x61f   : > { %v1577_v23 = vrot.slane %v1576_v21, 2  ;;  %v1588_v24 = vrot.slane %v1587_v22, 4 }
 0x621   : > { %v1589_v26 = vadd.f32 %v1588_v24, %v1587_v22  ;;  %v1578_v27 = vadd.f32 %v1577_v23, %v1576_v21 }
 0x623   : > { %v1590_v28 = vrot.slane %v1589_v26, 2  ;;  %v1579_v29 = vrot.slane %v1578_v27, 1 }
 0x625   : > { %v1591_v30 = vadd.f32 %v1590_v28, %v1589_v26  ;;  %v1580_v31 = vadd.f32 %v1579_v29, %v1578_v27 }
 0x627   : > { %2082 = vpush %v1580_v31  ;;  %v1592_v32 = vrot.slane %v1591_v30, 1 }
 0x629   : > { %v1593_v33 = vadd.f32 %v1592_v32, %v1591_v30 }
 0x62b   : > { %2084 = vpush %v1593_v33 }
 0x658   : > { %s2083_s12 = spop %2082 }
 0x659   : > { %s1582_s13 = smul.f32 0.083333336, %s2083_s12 }
 0x65b   : > { %v1605_v36 = vstv %s1582_s13 }
 0x65c   : > { %s2085_s26 = spop %2084 }
 0x65d   : > { %s1595_s10 = smul.f32 0.083333336, %s2085_s26 }
 0x65f   : > { %v1603_v35 = vstv %s1595_s10 }
 0x660   : > { %v1604_v45 = vsel %vm1602_vm0, %v1603_v35, 0.0 }
 0x661   : > { %v1606_v25 = vsel %vm1600_vm1, %v1605_v36, %v1604_v45 }
 0x662   : > { %1607 = vst [vmem:[%s295_s15] sm:$0xff] %v1606_v25 }
 0x663   : > { %2328 = shalt.err (!%p2325_p5)
}
 0x664   : > { %s2329_s12 = scalar_lea.hbm %s2754_s8, 128  ;;  %s2333_s13 = scalar_lea.hbm %s2797_s6, 256 }
 0x665   : > { %p2330_p9 = scmp.ne.s32.totalorder %s2754_s8, %s2329_s12  ;;  %p2334_p6 = scmp.lt.s32.totalorder %s2754_s8, %s2797_s6 }
 0x666   : > { %p2335_p8 = scmp.lt.s32.totalorder %s2333_s13, %s2329_s12 }
 0x667   : > { %p2331_p1 = pnand %p2330_p9, %p2813_p11 }
 0x668   : > { %p2336_p3 = por %p2335_p8, %p2334_p6 }
 0x669   : > { %p2332_p4 = pneg %p2331_p1 }
 0x66b   : > { %p2337_p7 = pnand %p2336_p3, %p2332_p4 }
 0x66d   : > { %2340 = shalt.err (!%p2337_p7)
}
 0x66e   : > { %2093 = dma.vmem_to_hbm [thread:$0]  (%p2813_p11), %s1644_s14, 128, %s2754_s8, %s1614_s25  }
 0x66f PF: > { %s1655_s15 = sand.u32 1, %s2375_s21   ;;  %p2814_p12 = scmp.ne.s32.totalorder %s2803_s28, 0 }
 0x670   : > { %p2815_p10 = scmp.ge.s32.totalorder %s2387_s24, 2  ;;  %s1656_s16 = scalar_lea.sflag [#allocation4], %s1655_s15 }
 0x672   : > { %p2105_p2 = pnand %p2815_p10, %p2814_p12 }
 0x674   : > { %p2106_p13 = pneg %p2105_p2 }
 0x676   : > { %2366 = dma.done.wait (%p2106_p13), %s1656_s16, 256  }
 0x677   : > { %2368 = vsyncadd (%p2106_p13), %s1656_s16, 4294967040  ;;  %s1665_s30 = scalar_lea.sflag [#allocation9], %s1655_s15 }
 0x678   : > { %2370 = dma.done.wait (%p2106_p13), %s1665_s30, 128  }
 0x679   : > { %2372 = vsyncadd (%p2106_p13), %s1665_s30, 4294967168  ;;  %p24_p11 = scmp.ge.s32.totalorder %s2489_s9, 4   ;;  %s2816_s21 = smov %s2379_s22 }
 0x67a   : > { %s2817_s22 = smov %s2383_s23  ;;  %s2818_s23 = smov %s2506_s17 }
 0x67b   : > { %s2819_s24 = smov %s2489_s9  ;;  %26 = sbr.rel (!%p24_p11) target bundleno = 8 (0x8), region = 106 }
 0x680   :  { %1670 = vsyncpa [#allocation3], 1 }
 0x681   :  { %1672 = vsyncpa [#allocation3 + $0x1], 1 }
 0x682   :  { %1673 = vsyncpa [#allocation6], 1 }
 0x683   :  { %1674 = vsyncpa [#allocation4], 1 }
 0x684   :  { %1676 = vsyncpa [#allocation4 + $0x1], 1 }
 0x685   :  { %1677 = vsyncpa [#allocation9], 1 }
 0x686   :  { %1679 = vsyncpa [#allocation9 + $0x1], 1 }

</bundles_post_ra>
